<compile_context>
chip_gen: v6e
topology: v6e:2x2x1
jax: 0.10.0
libtpu: 0.0.40
codegen_flags: <defaults>
</compile_context>

<pallas_src>
import jax
import jax.numpy as jnp
from jax.experimental import pallas as pl
from jax.experimental.pallas import tpu as pltpu

LANE = 128
COMPUTE_DTYPE = jnp.bfloat16


# ------------------------------ small helpers -------------------------------

def _round_up(x, m):
    return ((x + m - 1) // m) * m


def _to_nhwc(x):
    return jnp.transpose(x, (0, 2, 3, 1))


def _to_nchw(x):
    return jnp.transpose(x, (0, 3, 1, 2))


def _pool2x2(x_nhwc):
    n, h, w, c = x_nhwc.shape
    assert h % 2 == 0 and w % 2 == 0, "2x2 avg-pool needs even H and W"
    return x_nhwc.reshape(n, h // 2, 2, w // 2, 2, c).mean(axis=(2, 4))


def _upsample2(x_nhwc):
    # Nearest 2x upsample (wrapper glue; only used where the upsample feeds a
    # conv *input*, where it cannot be folded into the output tile).
    return jnp.repeat(jnp.repeat(x_nhwc, 2, axis=1), 2, axis=2)


def _im2col(x_nhwc, k, pad, ho_p, wo_p, k_pad, dtype):
    """(N,H,W,C) f32 -> (N, ho_p, wo_p, k_pad) stride-1 im2col patches.

    Last-axis layout is (kh, kw, cin) row-major, matching _pack_weight.
    Rows/cols beyond the true output extent and the packed-K tail are zeros.
    """
    _, h, w, c = x_nhwc.shape
    ho = h + 2 * pad - k + 1
    wo = w + 2 * pad - k + 1
    xp = jnp.pad(x_nhwc, ((0, 0), (pad, pad), (pad, pad), (0, 0)))
    cols = []
    for kh in range(k):
        for kw in range(k):
            cols.append(xp[:, kh:kh + ho, kw:kw + wo, :])
    patches = jnp.concatenate(cols, axis=-1)          # (N, ho, wo, k*k*c)
    patches = jnp.pad(patches, ((0, 0), (0, ho_p - ho), (0, wo_p - wo),
                                (0, k_pad - k * k * c)))
    return patches.astype(dtype)


def _pack_weight(w_oihw, k_pad, cout_p, mask, dtype):
    """OIHW f32 -> (k_pad, cout_p) packed weight with channel mask baked in."""
    o, i, kh, kw = w_oihw.shape
    w = jnp.transpose(w_oihw, (2, 3, 1, 0)).reshape(kh * kw * i, o)
    if mask is not None:
        lo, hi = mask
        ch = jnp.arange(o)
        keep = ((ch >= lo) & (ch < hi)).astype(w.dtype)
        w = w * keep[None, :]
    w = jnp.pad(w, ((0, k_pad - kh * kw * i), (0, cout_p - o)))
    return w.astype(dtype)


def _vmem_limit_bytes():
    # Generation-aware scoped-VMEM limit (v7x has 64 MiB total, v5e/v6e 128).
    try:
        cap = int(pltpu.get_tpu_info().vmem_capacity_bytes)
        return min(cap // 2, 64 * 1024 * 1024)
    except Exception:
        return None


def _plan(ho, wo, cop, need_half, acc_budget=160 * 1024):
    """Pick the output row tile: keep the f32 tile <= ~160 KiB (register
    friendly after in-register accumulation); tile even if a half-resolution
    fused addend is present.  Ho/Wo are padded (and later cropped) instead of
    collapsing to tiny tiles when they don't divide."""
    wo_p = _round_up(wo, 8)
    th = max(1, acc_budget // (wo_p * cop * 4))
    th = min(th, ho)
    if need_half:
        th = max(2, th - (th % 2))
    ho_p = _round_up(ho, th)
    return th, ho_p, wo_p


def _cost(n, ho, wo, kr_a, cout, hob=0, wob=0, kr_b=0):
    flops = 2 * n * (ho * wo * kr_a + hob * wob * kr_b) * cout
    bytes_in = 2 * n * (ho * wo * kr_a + hob * wob * kr_b)      # bf16 patches
    bytes_w = 2 * (kr_a + kr_b) * cout
    bytes_out = 4 * n * ho * wo * cout
    return pl.CostEstimate(flops=int(flops), transcendentals=0,
                           bytes_accessed=int(bytes_in + bytes_w + bytes_out))


# ------------------------------ Pallas kernel --------------------------------

def _make_kernel(th, wo, ka, cop, has_b, kb=None):
    """out_tile = pa @ wa  (+ row-upsampled( pb @ wb )), f32 accumulate."""
    thb = th // 2

    def kernel(*refs):
        it = iter(refs)
        pa_ref = next(it)
        wa_ref = next(it)
        if has_b:
            pb_ref = next(it)
            wb_ref = next(it)
        o_ref = next(it)

        # One deep-K MXU dot per operand; accumulate in registers (no VMEM
        # scratch RMW) and store the output tile exactly once.
        acc = jnp.dot(pa_ref[...].reshape(th * wo, ka), wa_ref[...],
                      preferred_element_type=jnp.float32)
        acc = acc.reshape(th, wo, cop)
        if has_b:
            accb = jnp.dot(pb_ref[...].reshape(thb * wo, kb), wb_ref[...],
                           preferred_element_type=jnp.float32)
            accb = accb.reshape(thb, wo, cop)
            # Nearest 2x row-upsample of the low-res conv result (leading-dim
            # repeat only; column duplication was done on the patch tensor).
            accb = jnp.repeat(accb, 2, axis=0)
            acc = acc + accb
        o_ref[...] = acc.astype(o_ref.dtype)

    return kernel


def _conv_matmul(pa, wa, *, tile_h, pb=None, wb=None,
                 out_dtype=jnp.float32, cost=None):
    """Fused conv-as-matmul over im2col patches.

    pa : (N, Ho_p, Wo_p, Ka)   bf16 patches (Ka multiple of 128)
    wa : (Ka, Cop)             bf16 packed weights (mask baked in)
    pb : optional (N, Ho_p//2, Wo_p, Kb) half-row-resolution patches whose dot
         result is 2x row-upsampled and added in-kernel (fused up(L2H(.))).
    Returns (N, Ho_p, Wo_p, Cop) in out_dtype.
    """
    n, ho_p, wo_p, ka = pa.shape
    cop = wa.shape[-1]
    th = tile_h
    has_b = pb is not None
    if has_b:
        assert th % 2 == 0 and ho_p % th == 0
        assert pb.shape[:3] == (n, ho_p // 2, wo_p)
    grid = (n, ho_p // th)  # N>=2 in practice -> both v7x TensorCores get work

    in_arrays = [pa, wa]
    in_specs = [
        pl.BlockSpec((None, th, wo_p, ka), lambda b, h: (b, h, 0, 0)),
        pl.BlockSpec((ka, cop), lambda b, h: (0, 0)),
    ]
    kb = None
    if has_b:
        kb = pb.shape[-1]
        in_arrays += [pb, wb]
        in_specs += [
            pl.BlockSpec((None, th // 2, wo_p, kb), lambda b, h: (b, h, 0, 0)),
            pl.BlockSpec((kb, cop), lambda b, h: (0, 0)),
        ]

    kernel = _make_kernel(th, wo_p, ka, cop, has_b, kb)

    return pl.pallas_call(
        kernel,
        out_shape=jax.ShapeDtypeStruct((n, ho_p, wo_p, cop), out_dtype),
        grid_spec=pltpu.PrefetchScalarGridSpec(
            num_scalar_prefetch=0,
            grid=grid,
            in_specs=in_specs,
            out_specs=pl.BlockSpec((None, th, wo_p, cop),
                                   lambda b, h: (b, h, 0, 0)),
        ),
        compiler_params=pltpu.CompilerParams(
            dimension_semantics=("parallel", "parallel"),
            vmem_limit_bytes=_vmem_limit_bytes(),
        ),
        cost_estimate=cost,
    )(*in_arrays)


# --------------------------------- OctConv ----------------------------------

class OctConvPallas:
    """JAX/Pallas port of the PyTorch OctConv module ('first'/'last'/'normal')."""

    def __init__(self, in_channels, out_channels, kernel_size, stride=1,
                 padding=0, alpha_in=0.25, alpha_out=0.25, type='normal',
                 key=None, compute_dtype=COMPUTE_DTYPE):
        # TODO(synk): only stride=1 convolutions are implemented in the kernel.
        assert stride == 1, "stride != 1 not implemented"
        self.in_channels = in_channels
        self.out_channels = out_channels
        self.kernel_size = kernel_size
        self.padding = padding
        self.type = type
        self.compute_dtype = compute_dtype
        self.cout_p = _round_up(out_channels, LANE)
        self.k_pack = _round_up(kernel_size * kernel_size * in_channels, LANE)

        key = jax.random.PRNGKey(42) if key is None else key

        def make_w(k):
            return 0.1 * jax.random.normal(
                k, (out_channels, in_channels, kernel_size, kernel_size),
                jnp.float32)

        ks = jax.random.split(key, 4)
        if type in ('first', 'last'):
            self.w = {'convh': make_w(ks[0]), 'convl': make_w(ks[1])}
        else:
            self.w = {'L2L': make_w(ks[0]), 'L2H': make_w(ks[1]),
                      'H2L': make_w(ks[2]), 'H2H': make_w(ks[3])}

    # ----- helpers -----
    def _out_hw(self, h, w):
        k, p = self.kernel_size, self.padding
        return h + 2 * p - k + 1, w + 2 * p - k + 1

    def _patches(self, x_nhwc, ho_p, wo_p):
        return _im2col(x_nhwc, self.kernel_size, self.padding, ho_p, wo_p,
                       self.k_pack, self.compute_dtype)

    def _weights(self, name, mask):
        return _pack_weight(self.w[name], self.k_pack, self.cout_p, mask,
                            self.compute_dtype)

    def _finish(self, y, ho, wo):
        return _to_nchw(y[:, :ho, :wo, :self.out_channels])

    # ----- forward (order=True branch of OctConv.mask) -----
    # TODO(synk): order=False (random.sample channel mask) is unreachable from
    # the PyTorch forward() and is not implemented.
    def forward(self, x, alpha_in, alpha_out):
        k, p, c = self.kernel_size, self.padding, self.out_channels
        hf_keep = int(c * (1 - alpha_out))
        kr = k * k * self.in_channels            # real contraction depth

        if self.type == 'first':
            xh = _to_nhwc(x).astype(jnp.float32)
            n, h, w, _ = xh.shape
            ho, wo = self._out_hw(h, w)
            th, ho_p, wo_p = _plan(ho, wo, self.cout_p, False)
            hf = _conv_matmul(self._patches(xh, ho_p, wo_p),
                              self._weights('convh', (0, hf_keep)),
                              tile_h=th, cost=_cost(n, ho, wo, kr, c))

            xl = _pool2x2(xh)
            hol, wol = self._out_hw(h // 2, w // 2)
            thl, hol_p, wol_p = _plan(hol, wol, self.cout_p, False)
            lf = _conv_matmul(self._patches(xl, hol_p, wol_p),
                              self._weights('convl', (hf_keep, c)),
                              tile_h=thl, cost=_cost(n, hol, wol, kr, c))
            return self._finish(hf, ho, wo), self._finish(lf, hol, wol)

        elif self.type == 'last':
            hf, lf = x
            hfh = _to_nhwc(hf).astype(jnp.float32)
            lfh = _to_nhwc(lf).astype(jnp.float32)
            n, h, w, _ = hfh.shape
            assert lfh.shape[1] * 2 == h and lfh.shape[2] * 2 == w
            ho, wo = self._out_hw(h, w)
            th, ho_p, wo_p = _plan(ho, wo, self.cout_p, False)
            # TODO(synk): the nearest upsample here feeds a conv *input*, so it
            # stays as XLA glue (fused into the im2col gather) rather than in
            # the kernel.
            pa = jnp.concatenate(
                [self._patches(hfh, ho_p, wo_p),
                 self._patches(_upsample2(lfh), ho_p, wo_p)], axis=-1)
            wa = jnp.concatenate(
                [self._weights('convh', None), self._weights('convl', None)],
                axis=0)                                  # single K=256 dot
            out = _conv_matmul(pa, wa, tile_h=th,
                               cost=_cost(n, ho, wo, 2 * kr, c))
            return self._finish(out, ho, wo)

        else:  # 'normal'
            hf, lf = x
            hfh = _to_nhwc(hf).astype(jnp.float32)
            lfh = _to_nhwc(lf).astype(jnp.float32)
            n, h, w, _ = hfh.shape
            hl, wl = lfh.shape[1], lfh.shape[2]
            assert hl * 2 == h and wl * 2 == w
            ho, wo = self._out_hw(h, w)
            hol, wol = self._out_hw(hl, wl)
            assert hol * 2 == ho and wol * 2 == wo, (
                "OctConv 'normal' requires a 'same' conv (2*padding == k-1) so "
                "up(L2H(lf)) matches H2H(hf).")

            # hf_out = mask_hf( H2H(hf) + up(L2H(lf)) ): the L2H conv is fused
            # into the same kernel; its low-res result is 2x-upsampled
            # in-registers (rows in-kernel, columns on the patch tensor), so
            # neither L2H(lf) nor its upsample ever touch HBM.
            th, ho_p, wo_p = _plan(ho, wo, self.cout_p, True)
            pb = self._patches(lfh, ho_p // 2, wo_p // 2)
            pb = jnp.repeat(pb, 2, axis=2)               # duplicate columns
            hf_out = _conv_matmul(
                self._patches(hfh, ho_p, wo_p),
                self._weights('H2H', (0, hf_keep)),
                tile_h=th,
                pb=pb, wb=self._weights('L2H', (0, hf_keep)),
                cost=_cost(n, ho, wo, kr, c, hol, wol, kr))

            # lf_out = mask_lf( L2L(lf) + H2L(pool(hf)) ): both convs run at low
            # resolution -> concatenate along K for one 256-deep dot.
            thl, hol_p, wol_p = _plan(hol, wol, self.cout_p, False)
            pa = jnp.concatenate(
                [self._patches(lfh, hol_p, wol_p),
                 self._patches(_pool2x2(hfh), hol_p, wol_p)], axis=-1)
            wa = jnp.concatenate(
                [self._weights('L2L', (hf_keep, c)),
                 self._weights('H2L', (hf_keep, c))], axis=0)
            lf_out = _conv_matmul(pa, wa, tile_h=thl,
                                  cost=_cost(n, hol, wol, 2 * kr, c))
            return self._finish(hf_out, ho, wo), self._finish(lf_out, hol, wol)

    # ----- plain-JAX (f32, NCHW) reference of the PyTorch module -----
    def reference_forward(self, x, alpha_in, alpha_out):
        p = self.padding

        def conv(t, w):
            return jax.lax.conv_general_dilated(
                t, w, (1, 1), [(p, p), (p, p)],
                dimension_numbers=('NCHW', 'OIHW', 'NCHW'))

        def pool(t):
            n, ch, h, w = t.shape
            return t.reshape(n, ch, h // 2, 2, w // 2, 2).mean(axis=(3, 5))

        def up(t):
            return jnp.repeat(jnp.repeat(t, 2, axis=2), 2, axis=3)

        c = self.out_channels
        k = int(c * (1 - alpha_out))
        ch = jnp.arange(c)
        mh = ((ch >= 0) & (ch < k)).astype(jnp.float32)[None, :, None, None]
        ml = ((ch >= k) & (ch < c)).astype(jnp.float32)[None, :, None, None]

        if self.type == 'first':
            hf = conv(x, self.w['convh'])
            lf = conv(pool(x), self.w['convl'])
            return hf * mh, lf * ml
        elif self.type == 'last':
            hf, lf = x
            return conv(hf, self.w['convh']) + conv(up(lf), self.w['convl'])
        else:
            hf, lf = x
            hf_o = conv(hf, self.w['H2H']) + up(conv(lf, self.w['L2H']))
            lf_o = conv(lf, self.w['L2L']) + conv(pool(hf), self.w['H2L'])
            return hf_o * mh, lf_o * ml


# ----------------------------------- main ------------------------------------

if __name__ == "__main__":
    key = jax.random.PRNGKey(0)
    k_hf, k_lf, k_x, k_w = jax.random.split(key, 4)

    N, C, H, W = 2, 4, 16, 16
    hf = jax.random.normal(k_hf, (N, C, H, W), jnp.float32)
    lf = jax.random.normal(k_lf, (N, C, H // 2, W // 2), jnp.float32)
    x = jax.random.normal(k_x, (N, C, H, W), jnp.float32)

    tol = dict(rtol=2e-2, atol=2e-2)  # bf16 MXU compute vs f32 reference

    # 'normal' octave conv: 3x3, stride 1, padding 1
    oct_n = OctConvPallas(C, C, 3, stride=1, padding=1, type='normal', key=k_w)
    hf_o, lf_o = oct_n.forward((hf, lf), 0.25, 0.25)
    jax.block_until_ready((hf_o, lf_o))
    hf_r, lf_r = oct_n.reference_forward((hf, lf), 0.25, 0.25)
    assert hf_o.shape == (N, C, H, W) and lf_o.shape == (N, C, H // 2, W // 2)
    assert jnp.allclose(hf_o, hf_r, **tol)
    assert jnp.allclose(lf_o, lf_r, **tol)

    # 'first'
    oct_f = OctConvPallas(C, C, 3, stride=1, padding=1, type='first', key=k_w)
    f_hf, f_lf = oct_f.forward(x, 0.25, 0.25)
    r_hf, r_lf = oct_f.reference_forward(x, 0.25, 0.25)
    assert jnp.allclose(f_hf, r_hf, **tol)
    assert jnp.allclose(f_lf, r_lf, **tol)

    # 'last'
    oct_l = OctConvPallas(C, C, 3, stride=1, padding=1, type='last', key=k_w)
    y = oct_l.forward((hf, lf), 0.25, 0.25)
    y_r = oct_l.reference_forward((hf, lf), 0.25, 0.25)
    assert jnp.allclose(y, y_r, **tol)

    jax.block_until_ready((f_hf, f_lf, y))
    print("KERNEL_OK")
</pallas_src>

<mosaic_0001>
module attributes {stable_mosaic.version = 11 : i64} {
  func.func @kernel(%arg0: i32, %arg1: i32, %arg2: memref<1x16x16x128xbf16, #tpu.memory_space<vmem>>, %arg3: memref<128x128xbf16, #tpu.memory_space<vmem>>, %arg4: memref<1x8x16x128xbf16, #tpu.memory_space<vmem>>, %arg5: memref<128x128xbf16, #tpu.memory_space<vmem>>, %arg6: memref<1x16x16x128xf32, #tpu.memory_space<vmem>>) attributes {dimension_semantics = [#tpu.dimension_semantics<parallel>, #tpu.dimension_semantics<parallel>], iteration_bounds = array<i64: 2, 1>, scalar_prefetch = 0 : i64, scratch_operands = 0 : i64, tpu.core_type = #tpu.core_type<tc>, window_params = [{transform_indices = @transform_0, window_bounds = array<i64: 1, 16, 16, 128>}, {pipeline_mode = #tpu.pipeline_mode<synchronous>, transform_indices = @transform_1, window_bounds = array<i64: 128, 128>}, {transform_indices = @transform_2, window_bounds = array<i64: 1, 8, 16, 128>}, {pipeline_mode = #tpu.pipeline_mode<synchronous>, transform_indices = @transform_3, window_bounds = array<i64: 128, 128>}, {transform_indices = @transform_4, window_bounds = array<i64: 1, 16, 16, 128>}]} {
    %c0 = arith.constant 0 : index
    %c0_0 = arith.constant 0 : index
    %c0_1 = arith.constant 0 : index
    %c0_2 = arith.constant 0 : index
    %0 = vector.load %arg2[%c0, %c0_0, %c0_1, %c0_2] : memref<1x16x16x128xbf16, #tpu.memory_space<vmem>>, vector<1x16x16x128xbf16>
    %1 = vector.shape_cast %0 : vector<1x16x16x128xbf16> to vector<16x16x128xbf16>
    %2 = vector.shape_cast %1 : vector<16x16x128xbf16> to vector<256x128xbf16>
    %c0_3 = arith.constant 0 : index
    %c0_4 = arith.constant 0 : index
    %3 = vector.load %arg3[%c0_3, %c0_4] : memref<128x128xbf16, #tpu.memory_space<vmem>>, vector<128x128xbf16>
    %cst = arith.constant dense<0.000000e+00> : vector<256x128xf32>
    %4 = tpu.matmul %2, %3, %cst {dimension_numbers = #tpu.dot_dimension_numbers<[1], [0], [0], [1], [0, 0, 1, 1], [], []>} : vector<256x128xbf16>, vector<128x128xbf16>, vector<256x128xf32> -> vector<256x128xf32>
    %5 = vector.shape_cast %4 : vector<256x128xf32> to vector<16x16x128xf32>
    %c0_5 = arith.constant 0 : index
    %c0_6 = arith.constant 0 : index
    %c0_7 = arith.constant 0 : index
    %c0_8 = arith.constant 0 : index
    %6 = vector.load %arg4[%c0_5, %c0_6, %c0_7, %c0_8] : memref<1x8x16x128xbf16, #tpu.memory_space<vmem>>, vector<1x8x16x128xbf16>
    %7 = vector.shape_cast %6 : vector<1x8x16x128xbf16> to vector<8x16x128xbf16>
    %8 = vector.shape_cast %7 : vector<8x16x128xbf16> to vector<128x128xbf16>
    %c0_9 = arith.constant 0 : index
    %c0_10 = arith.constant 0 : index
    %9 = vector.load %arg5[%c0_9, %c0_10] : memref<128x128xbf16, #tpu.memory_space<vmem>>, vector<128x128xbf16>
    %cst_11 = arith.constant dense<0.000000e+00> : vector<128x128xf32>
    %10 = tpu.matmul %8, %9, %cst_11 {dimension_numbers = #tpu.dot_dimension_numbers<[1], [0], [0], [1], [0, 0, 1, 1], [], []>} : vector<128x128xbf16>, vector<128x128xbf16>, vector<128x128xf32> -> vector<128x128xf32>
    %11 = vector.shape_cast %10 : vector<128x128xf32> to vector<8x16x128xf32>
    %12 = vector.shape_cast %11 : vector<8x16x128xf32> to vector<8x1x16x128xf32>
    %13 = vector.broadcast %12 : vector<8x1x16x128xf32> to vector<8x2x16x128xf32>
    %14 = vector.shape_cast %13 : vector<8x2x16x128xf32> to vector<16x16x128xf32>
    %15 = arith.addf %5, %14 : vector<16x16x128xf32>
    %c0_12 = arith.constant 0 : index
    %c0_13 = arith.constant 0 : index
    %c0_14 = arith.constant 0 : index
    %c0_15 = arith.constant 0 : index
    %16 = vector.load %arg6[%c0_12, %c0_13, %c0_14, %c0_15] : memref<1x16x16x128xf32, #tpu.memory_space<vmem>>, vector<1x16x16x128xf32>
    %17 = vector.shape_cast %16 : vector<1x16x16x128xf32> to vector<16x16x128xf32>
    %18 = vector.shape_cast %15 : vector<16x16x128xf32> to vector<1x16x16x128xf32>
    tpu.vector_store %arg6[%c0_12, %c0_13, %c0_14, %c0_15], %18 {strides = array<i32>} : memref<1x16x16x128xf32, #tpu.memory_space<vmem>>, vector<1x16x16x128xf32>,
    return
  }
  func.func @transform_0(%arg0: i32, %arg1: i32) -> (i32, i32, i32, i32) {
    %c0_i32 = arith.constant 0 : i32
    %c0_i32_0 = arith.constant 0 : i32
    %c0_i32_1 = arith.constant 0 : i32
    return %arg0, %arg1, %c0_i32, %c0_i32_0 : i32, i32, i32, i32
  }
  func.func @transform_1(%arg0: i32, %arg1: i32) -> (i32, i32) {
    %c0_i32 = arith.constant 0 : i32
    %c0_i32_0 = arith.constant 0 : i32
    %c0_i32_1 = arith.constant 0 : i32
    return %c0_i32, %c0_i32_0 : i32, i32
  }
  func.func @transform_2(%arg0: i32, %arg1: i32) -> (i32, i32, i32, i32) {
    %c0_i32 = arith.constant 0 : i32
    %c0_i32_0 = arith.constant 0 : i32
    %c0_i32_1 = arith.constant 0 : i32
    return %arg0, %arg1, %c0_i32, %c0_i32_0 : i32, i32, i32, i32
  }
  func.func @transform_3(%arg0: i32, %arg1: i32) -> (i32, i32) {
    %c0_i32 = arith.constant 0 : i32
    %c0_i32_0 = arith.constant 0 : i32
    %c0_i32_1 = arith.constant 0 : i32
    return %c0_i32, %c0_i32_0 : i32, i32
  }
  func.func @transform_4(%arg0: i32, %arg1: i32) -> (i32, i32, i32, i32) {
    %c0_i32 = arith.constant 0 : i32
    %c0_i32_0 = arith.constant 0 : i32
    %c0_i32_1 = arith.constant 0 : i32
    return %arg0, %arg1, %c0_i32, %c0_i32_0 : i32, i32, i32, i32
  }
}

</mosaic_0001>

<bundles_post_ra>
// kernel: tpu_custom_call.1
= control target key start
LH: loop header
LB: loop body
LE: loop exit
PB: predicated region body
PF: predicated region fallthrough
CT: control target
= control target key end

     0   :  { %s1945_s0 = inlined_call_operand.hbm [shape: bf16[2,16,16,128], index: 0, kind: input, shape index: {}]   ;;  %s1946_s1 = inlined_call_operand.hbm [shape: bf16[128,128], index: 1, kind: input, shape index: {}]   ;;  %s1947_s2 = inlined_call_operand.hbm [shape: bf16[2,8,16,128], index: 2, kind: input, shape index: {}]   ;;  %s1948_s3 = inlined_call_operand.hbm [shape: bf16[128,128], index: 3, kind: input, shape index: {}]   ;;  %s1949_s4 = inlined_call_operand.hbm [shape: f32[2,16,16,128], index: 4, kind: output, shape index: {}]  }
   0x1   :  { %1958 = sst [smem:[#allocation17_spill]] %s1945_s0 }
   0x2   :  { %1959 = sst [smem:[#allocation18_spill]] %s1946_s1 }
   0x3   :  { %9 = vsyncpa [#allocation3], 0 }
   0x4   :  { %11 = vsyncpa [#allocation3 + $0x1], 0 }
   0x5   :  { %12 = vsyncpa [#allocation6], 0 }
   0x6   :  { %13 = vsyncpa [#allocation4], 0 }
   0x7   :  { %15 = vsyncpa [#allocation4 + $0x1], 0  ;;  %s1652_s15 = smov 0   ;;  %s1654_s16 = smov 0  }
   0x8   :  { %s1656_s17 = smov 0   ;;  %s1658_s18 = smov 0  }
   0x9   :  { %s1660_s19 = smov 0   ;;  %s1662_s20 = smov 0  }
   0xa LB: > { %s1683_s21 = sadd.s32 4294967295, %s1616_s20   ;;  %s1099_s22 = sadd.s32 4294967294, %s1616_s20   ;;  %s1616_s20 = sphi %s1662_s20, %s21_s20   ;;  %s1612_s19 = sphi %s1660_s19, %s1988_s19   ;;  %s1608_s18 = sphi %s1658_s18, %s1987_s18   ;;  %s1604_s17 = sphi %s1656_s17, %s1986_s17   ;;  %s1600_s16 = sphi %s1654_s16, %s1985_s16   ;;  %s1596_s15 = sphi %s1652_s15, %s1984_s15  }
   0xb   : > { %p55_p0 = scmp.ne.s32.totalorder %s1600_s16, %s1596_s15  ;;  %p1955_p1 = scmp.eq.s32.totalorder %s1683_s21, 0 }
   0xc   : > { %p157_p3 = scmp.eq.s32.totalorder %s1099_s22, 1  ;;  %p1100_p5 = scmp.ge.s32.totalorder %s1616_s20, 1 }
   0xd   : > { %p1692_p4 = por %p1955_p1, %p55_p0  ;;  %p164_p7 = scmp.lt.s32.totalorder %s1616_s20, 3 }
   0xe   : > { %p1697_p6 = por %p157_p3, %p55_p0  ;;  %s1618_s26 = smov [#allocation5]  }
   0xf   : > { %p1702_p8 = pnand %p1100_p5, %p164_p7  ;;  %s176_s27 = sshll.u32 %s1618_s26, 4  ;;  %s177_s27 = int_to_ptr.vmem [resolvable:$true] %s176_s27 }
  0x10   : > { %s1961_s24 = scalar_select %p1697_p6, 1, 0 }
  0x11   : > { %p1298_p9 = pneg %p1702_p8  ;;  %s33_s29 = sadd.s32 1, %s1612_s19 }
  0x12   : > { %s1427_s30 = scalar_lea.vmem %s177_s27, 1024  ;;  %p1435_p5 = scmp.lt.s32.totalorder %s177_s27, %s177_s27 }
  0x13   : > { %p1711_p11 = pnand %p1298_p9, %p1955_p1  ;;  %p1428_p13 = scmp.ne.s32.totalorder %s177_s27, %s1427_s30 }
  0x14   : > { %p1436_p7 = scmp.lt.s32.totalorder %s1427_s30, %s1427_s30 }
  0x15   : > { %p1956_p12 = pneg %p1711_p11 }
  0x16   : > { %p1437_p2 = por %p1436_p7, %p1435_p5 }
  0x17   : > { %p1430_p0 = pnand %p1428_p13, %p1956_p12 }
  0x19   : > { %p1431_p3 = pneg %p1430_p0 }
  0x1b   : > { %p1438_p10 = pnand %p1437_p2, %p1431_p3 }
  0x1d   : > { %1441 = shalt.err (!%p1438_p10)
}
  0x1e   : > { %s1950_s5 = smov 64   ;;  %s1952_s6 = smov 4  }
  0x1f   : > { %s1964_s1 = sld [smem:[#allocation18_spill]]  ;;  %p35_p2 = scmp.ge.s32.totalorder %s33_s29, 2 }
  0x20   : > { %s42_s9 = sadd.s32 1, %s1604_s17  ;;  %p49_p9 = scmp.ne.s32.totalorder %s1604_s17, %s1600_s16 }
  0x21   : > { %p50_p10 = scmp.eq.s32.totalorder %s1616_s20, 0  ;;  %s1990_s29 = smov (%p35_p2, %s33_s29), 0 }
  0x22   : > { %1965 = sst [smem:[#allocation15_spill]] %s1990_s29  ;;  %p1967_p0 = scmp.eq.s32.totalorder %s1683_s21, 1 }
  0x23   : > { %p1735_p13 = por %p50_p10, %p49_p9  ;;  %s37_s12 = ssub.s32 %s1612_s19, %s1990_s29 }
  0x24   : > { %p1741_p3 = por %p1967_p0, %p49_p9  ;;  %p1318_p5 = scmp.lt.s32.totalorder %s1616_s20, 2 }
  0x25   : > { %1301 = dma.hbm_to_vmem [thread:$0]  (!%p1711_p11), %s1964_s1, 1024, %s177_s27, [#allocation6], %s1950_s5, %s1950_s5, %s1952_s6  }
  0x26   : > { %p40_p7 = scmp.eq.s32.totalorder %s37_s12, 0  ;;  %s203_s13 = sand.u32 1, %s1616_s20  }
  0x27   : > { %s205_s14 = sand.u32 1, %s1604_s17   ;;  %s1161_s27 = sshll.u32 %s1612_s19, 11 }
  0x28   : > { %s1751_s22 = scalar_select %p40_p7, %s1604_s17, %s42_s9  }
  0x29   : > { %s1104_s26 = sshll.u32 %s205_s14, 7  ;;  %s1970_s0 = sld [smem:[#allocation17_spill]] }
  0x2a   : > { %1969 = sst [smem:[#allocation16_spill]] %s1751_s22  ;;  %s207_s5 = scalar_lea.vmem [#allocation2], %s1104_s26 }
  0x2b   : > { %s217_s6 = sshll.u32 %s207_s5, 4  ;;  %p1759_p2 = pnand %p1318_p5, %p1735_p13  ;;  %s218_s6 = int_to_ptr.vmem [resolvable:$true] %s217_s6 }
  0x2c   : > { %s1107_s12 = sshll.u32 %s205_s14, 6  ;;  %s1763_s29 = scalar_lea.sflag [#allocation3], %s203_s13 }
  0x2d   : > { %p1957_p9 = pneg %p1759_p2  ;;  %s1455_s9 = scalar_lea.vmem %s218_s6, 2048 }
  0x2e   : > { %p1456_p10 = scmp.ne.s32.totalorder %s218_s6, %s1455_s9  ;;  %s1621_s5 = smov [#allocation2]  }
  0x2f   : > { %s216_s8 = scalar_lea.hbm %s1970_s0, %s1161_s27  ;;  %s1460_s10 = sshll.u32 %s1621_s5, 4  ;;  %s1461_s10 = int_to_ptr.vmem [resolvable:$false] %s1460_s10 }
  0x30   : > { %p1458_p0 = pnand %p1456_p10, %p1957_p9  ;;  %s1462_s26 = scalar_lea.vmem %s1461_s10, 4096 }
  0x31   : > { %p1463_p13 = scmp.lt.s32.totalorder %s218_s6, %s1461_s10  ;;  %p1464_p5 = scmp.lt.s32.totalorder %s1462_s26, %s1455_s9 }
  0x32   : > { %p1459_p7 = pneg %p1458_p0 }
  0x33   : > { %p1465_p1 = por %p1464_p5, %p1463_p13 }
  0x35   : > { %p1466_p12 = pnand %p1465_p1, %p1459_p7 }
  0x37   : > { %1469 = shalt.err (!%p1466_p12)
}
  0x38   : > { %s1972_s13 = smov 4   ;;  %s1973_s14 = smov 64  }
  0x39   : > { %1308 = dma.hbm_to_vmem [thread:$0]  (!%p1759_p2), %s216_s8, 2048, %s218_s6, %s1763_s29, %s1973_s14, %s1973_s14, %s1972_s13  }
  0x3a   : > { %s231_s27 = scalar_lea.vmem [#allocation7], %s1107_s12  ;;  %s1622_s7 = smov [#allocation8]  }
  0x3b   : > { %s241_s30 = sshll.u32 %s231_s27, 4  ;;  %s189_s5 = sshll.u32 %s1622_s7, 4  ;;  %s190_s5 = int_to_ptr.vmem [resolvable:$true] %s189_s5  ;;  %s242_s30 = int_to_ptr.vmem [resolvable:$true] %s241_s30 }
  0x3c   : > { %s1162_s0 = sshll.u32 %s1612_s19, 10  ;;  %s1481_s22 = scalar_lea.vmem %s190_s5, 1024 }
  0x3d   : > { %s1780_s26 = scalar_lea.hbm %s1947_s2, %s1162_s0  ;;  %p1482_p1 = scmp.ne.s32.totalorder %s190_s5, %s1481_s22 }
  0x3e   : > { %p1974_p12 = pneg %p1711_p11  ;;  %p1489_p7 = scmp.lt.s32.totalorder %s190_s5, %s190_s5 }
  0x3f   : > { %p1490_p13 = scmp.lt.s32.totalorder %s1481_s22, %s1481_s22 }
  0x40   : > { %p1484_p10 = pnand %p1482_p1, %p1974_p12 }
  0x41   : > { %p1491_p5 = por %p1490_p13, %p1489_p7 }
  0x42   : > { %p1485_p0 = pneg %p1484_p10 }
  0x44   : > { %p1492_p9 = pnand %p1491_p5, %p1485_p0 }
  0x46   : > { %1495 = shalt.err (!%p1492_p9)
}
  0x47   : > { %1304 = dma.hbm_to_vmem [thread:$0]  (!%p1711_p11), %s1948_s3, 1024, %s190_s5, [#allocation6], %s1973_s14, %s1973_s14, %s1972_s13  }
  0x48   : > { %s1509_s0 = scalar_lea.vmem %s242_s30, 1024  ;;  %p1975_p1 = pneg %p1759_p2 }
  0x49   : > { %p1510_p6 = scmp.ne.s32.totalorder %s242_s30, %s1509_s0  ;;  %s1623_s22 = smov [#allocation7]  }
  0x4a   : > { %s1514_s12 = sshll.u32 %s1623_s22, 4  ;;  %s1515_s12 = int_to_ptr.vmem [resolvable:$false] %s1514_s12 }
  0x4b   : > { %p1512_p12 = pnand %p1510_p6, %p1975_p1  ;;  %s1516_s27 = scalar_lea.vmem %s1515_s12, 2048 }
  0x4c   : > { %p1517_p9 = scmp.lt.s32.totalorder %s242_s30, %s1515_s12  ;;  %p1518_p0 = scmp.lt.s32.totalorder %s1516_s27, %s1509_s0 }
  0x4d   : > { %p1513_p10 = pneg %p1512_p12 }
  0x4e   : > { %p1519_p7 = por %p1518_p0, %p1517_p9 }
  0x50   : > { %p1520_p13 = pnand %p1519_p7, %p1513_p10 }
  0x52   : > { %1523 = shalt.err (!%p1520_p13)
}
  0x53   : > { %1311 = dma.hbm_to_vmem [thread:$0]  (!%p1759_p2), %s1780_s26, 1024, %s242_s30, %s1763_s29, %s1973_s14, %s1973_s14, %s1972_s13  }
  0x54   : > { %253 = sbr.rel (%p1702_p8) target bundleno = 403 (0x193), region = 36  ;;  %s255_s28 = sand.u32 (!%p1702_p8), 1, %s1683_s21  }
  0x55   : > { %s1807_s7 = sand.u32 (!%p1702_p8), 1, %s1600_s16   ;;  %s256_s10 = scalar_lea.sflag (!%p1702_p8), [#allocation3], %s255_s28 }
  0x56   : > { %s1111_s5 = sshll.u32 (!%p1702_p8), %s1807_s7, 7 }
  0x57   : > { %s1810_s9 = scalar_lea.vmem (!%p1702_p8), [#allocation2], %s1111_s5 }
  0x59   : > { %1575 = dma.done.wait (%p1692_p4), %s256_s10, 2048  }
  0x5a   : > { %1577 = vsyncadd (%p1692_p4), %s256_s10, 4294965248  ;;  %p1976_p6 = scmp.eq.s32.totalorder %s1683_s21, 0 }
  0x5c   : > { %1579 = dma.done.wait (%p1976_p6), [#allocation6], 1024   ;;  %p1977_p8 = pmov %p1976_p6 }
  0x5d   : > { %s1113_s1 = sshll.u32 %s1807_s7, 6 }
  0x5e   : > { %1581 = vsyncadd (%p1977_p8), [#allocation6], 4294966272  ;;  %s1821_s25 = scalar_lea.vmem [#allocation7], %s1113_s1 }
  0x5f   : > { %1583 = dma.done.wait (%p1692_p4), %s256_s10, 1024  }
  0x60   : > { %1585 = vsyncadd (%p1692_p4), %s256_s10, 4294966272  ;;  %p1978_p11 = pmov %p1976_p6 }
  0x61   : > { %p1979_p2 = pmov %p1976_p6 }
  0x62   : > { %1587 = dma.done.wait (%p1978_p11), [#allocation6], 1024  }
  0x63   : > { %1589 = vsyncadd (%p1979_p2), [#allocation6], 4294966272  ;;  %v1376_v0 = vld [vmem:[#allocation5 + $0x38] sm:$0xff]   ;;  %v1378_v2 = vld [vmem:[#allocation5 + $0x30] sm:$0xff]   ;;  %s1115_s21 = sshll.u32 %s1807_s7, 8  ;;  %s1163_s29 = sshll.u32 %s1608_s18, 12 }
  0x64   : > { %v1377_v1 = vld [vmem:[#allocation8 + $0x38] sm:$0xff]   ;;  %1204 = vmatprep.subr.bf16.mxu0 %v1376_v0  ;;  %v1379_v3 = vld [vmem:[#allocation8 + $0x30] sm:$0xff]   ;;  %v1380_v4 = vld [vmem:[#allocation5 + $0x28] sm:$0xff]   ;;  %s1856_s23 = scalar_lea.vmem [#allocation9], %s1115_s21  ;;  %s1893_s26 = scalar_lea.hbm %s1949_s4, %s1163_s29 }
  0x65   : > { %1252 = vmatprep.subr.bf16.mxu1 %v1377_v1  ;;  %1205 = vmatpush3.bf16.msra.mxu0 %v1376_v0  ;;  %v1381_v5 = vld [vmem:[#allocation8 + $0x28] sm:$0xff]   ;;  %v1382_v6 = vld [vmem:[#allocation5 + $0x20] sm:$0xff]   ;;  %v1384_v8 = vld [vmem:[#allocation5 + $0x18] sm:$0xff]   ;;  %s969_s13 = sshll.u32 %s1856_s23, 4  ;;  %s953_s6 = scalar_lea.sflag [#allocation4], %s1807_s7  ;;  %s1895_s13 = int_to_ptr.vmem [resolvable:$true] %s969_s13 }
  0x66   : > { %1253 = vmatpush3.bf16.msra.mxu1 %v1377_v1  ;;  %1206 = vmatprep.subr.bf16.mxu0 %v1378_v2  ;;  %v1383_v7 = vld [vmem:[#allocation8 + $0x20] sm:$0xff]   ;;  %v1385_v9 = vld [vmem:[#allocation8 + $0x18] sm:$0xff]   ;;  %v1386_v10 = vld [vmem:[#allocation5 + $0x10] sm:$0xff]   ;;  %s1524_s18 = scalar_lea.vmem %s1895_s13, 4096  ;;  %s1624_s8 = smov [#allocation9]  }
  0x67   : > { %1254 = vmatprep.subr.bf16.mxu1 %v1379_v3  ;;  %v1387_v11 = vld [vmem:[#allocation8 + $0x10] sm:$0xff]   ;;  %v1392_v12 = vld [vmem:[%s1810_s9] sm:$0xff]   ;;  %v1388_v14 = vld [vmem:[#allocation5 + $0x8] sm:$0xff]   ;;  %p1525_p4 = scmp.ne.s32.totalorder %s1895_s13, %s1524_s18  ;;  %s1528_s0 = sshll.u32 %s1624_s8, 4  ;;  %s1529_s0 = int_to_ptr.vmem [resolvable:$false] %s1528_s0 }
  0x68   : > { %v1393_v13 = vld [vmem:[%s1821_s25] sm:$0xff]   ;;  %1220 = vmatprep.mubr.bf16.mxu0 %v1392_v12  ;;  %v1389_v15 = vld [vmem:[#allocation8 + $0x8] sm:$0xff]   ;;  %v1396_v20 = vld [vmem:[%s1810_s9 + $0x10] sm:$0xff]   ;;  %s1530_s22 = scalar_lea.vmem %s1529_s0, 8192  ;;  %p1531_p12 = scmp.lt.s32.totalorder %s1895_s13, %s1529_s0 }
  0x69   : > { %1207 = vmatpush3.bf16.msra.mxu0 %v1378_v2  ;;  %1268 = vmatprep.mubr.bf16.mxu1 %v1393_v13  ;;  %v1390_v16 = vld [vmem:[#allocation5] sm:$0xff]   ;;  %v1394_v18 = vld [vmem:[%s1810_s9 + $0x8] sm:$0xff]   ;;  %v1398_v21 = vld [vmem:[%s1821_s25 + $0x10] sm:$0xff]   ;;  %p1526_p5 = pnand %p1525_p4, %p1741_p3  ;;  %p1532_p10 = scmp.lt.s32.totalorder %s1530_s22, %s1524_s18 }
  0x6a   : > { %1255 = vmatpush3.bf16.msra.mxu1 %v1379_v3  ;;  %1208 = vmatprep.subr.bf16.mxu0 %v1380_v4  ;;  %v1391_v17 = vld [vmem:[#allocation8] sm:$0xff]   ;;  %v1395_v19 = vld [vmem:[%s1821_s25 + $0x8] sm:$0xff]   ;;  %v1397_v22 = vld [vmem:[%s1810_s9 + $0x18] sm:$0xff]  }
  0x6b   : > { %1256 = vmatprep.subr.bf16.mxu1 %v1381_v5  ;;  %v1399_v23 = vld [vmem:[%s1821_s25 + $0x18] sm:$0xff]   ;;  %v1400_v24 = vld [vmem:[%s1810_s9 + $0x20] sm:$0xff]   ;;  %v1401_v26 = vld [vmem:[%s1810_s9 + $0x28] sm:$0xff]   ;;  %p1527_p1 = pneg %p1526_p5  ;;  %p1533_p9 = por %p1532_p10, %p1531_p12 }
  0x6c   : > { %v1404_v25 = vld [vmem:[%s1821_s25 + $0x20] sm:$0xff]   ;;  %v1402_v27 = vld [vmem:[%s1810_s9 + $0x30] sm:$0xff]   ;;  %v1405_v28 = vld [vmem:[%s1821_s25 + $0x28] sm:$0xff]  }
  0x6d   : > { %1209 = vmatpush3.bf16.msra.mxu0 %v1380_v4  ;;  %v1410_v29 = vld [vmem:[%s1821_s25 + $0x30] sm:$0xff]   ;;  %v1403_v30 = vld [vmem:[%s1810_s9 + $0x38] sm:$0xff]   ;;  %v1406_v31 = vld [vmem:[%s1810_s9 + $0x40] sm:$0xff]   ;;  %p1534_p0 = pnand %p1533_p9, %p1527_p1 }
  0x6e   : > { %1257 = vmatpush3.bf16.msra.mxu1 %v1381_v5  ;;  %1210 = vmatprep.subr.bf16.mxu0 %v1382_v6  ;;  %v1411_v32 = vld [vmem:[%s1821_s25 + $0x38] sm:$0xff]   ;;  %v1407_v33 = vld [vmem:[%s1810_s9 + $0x48] sm:$0xff]   ;;  %v1408_v34 = vld [vmem:[%s1810_s9 + $0x50] sm:$0xff]  }
  0x6f   : > { %1258 = vmatprep.subr.bf16.mxu1 %v1383_v7  ;;  %v1409_v35 = vld [vmem:[%s1810_s9 + $0x58] sm:$0xff]   ;;  %v1412_v36 = vld [vmem:[%s1810_s9 + $0x60] sm:$0xff]   ;;  %v1413_v37 = vld [vmem:[%s1810_s9 + $0x68] sm:$0xff]  }
  0x70   : > { %v1414_v38 = vld [vmem:[%s1810_s9 + $0x70] sm:$0xff]   ;;  %v1415_v39 = vld [vmem:[%s1810_s9 + $0x78] sm:$0xff]  }
  0x71   : > { %1211 = vmatpush3.bf16.msra.mxu0 %v1382_v6 }
  0x72   : > { %1259 = vmatpush3.bf16.msra.mxu1 %v1383_v7  ;;  %1212 = vmatprep.subr.bf16.mxu0 %v1384_v8 }
  0x73   : > { %1260 = vmatprep.subr.bf16.mxu1 %v1385_v9 }
  0x75   : > { %1213 = vmatpush3.bf16.msra.mxu0 %v1384_v8 }
  0x76   : > { %1261 = vmatpush3.bf16.msra.mxu1 %v1385_v9  ;;  %1214 = vmatprep.subr.bf16.mxu0 %v1386_v10 }
  0x77   : > { %1262 = vmatprep.subr.bf16.mxu1 %v1387_v11 }
  0x79   : > { %1215 = vmatpush3.bf16.msra.mxu0 %v1386_v10 }
  0x7a   : > { %1263 = vmatpush3.bf16.msra.mxu1 %v1387_v11  ;;  %1216 = vmatprep.subr.bf16.mxu0 %v1388_v14 }
  0x7b   : > { %1264 = vmatprep.subr.bf16.mxu1 %v1389_v15 }
  0x7d   : > { %1217 = vmatpush3.bf16.msra.mxu0 %v1388_v14 }
  0x7e   : > { %1265 = vmatpush3.bf16.msra.mxu1 %v1389_v15  ;;  %1218 = vmatprep.subr.bf16.mxu0 %v1390_v16 }
  0x7f   : > { %1266 = vmatprep.subr.bf16.mxu1 %v1391_v17 }
  0x81   : > { %1219 = vmatpush3.bf16.msra.mxu0 %v1390_v16 }
  0x82   : > { %1267 = vmatpush3.bf16.msra.mxu1 %v1391_v17 }
  0x84   : > { %1221 = vmatmul.mubr.bf16.vlgmr.msra.gmra.mxu0 %v1394_v18 }
  0x85   : > { %1269 = vmatmul.mubr.bf16.vlgmr.msra.gmra.mxu1 %v1395_v19  ;;  %1224 = vmatprep.mubr.bf16.mxu0 %v1396_v20 }
  0x86   : > { %1272 = vmatprep.mubr.bf16.mxu1 %v1398_v21 }
  0x8c   : > { %1225 = vmatmul.mubr.bf16.gmra.mxu0 %v1397_v22 }
  0x8d   : > { %1273 = vmatmul.mubr.bf16.gmra.mxu1 %v1399_v23  ;;  %1228 = vmatprep.mubr.bf16.mxu0 %v1400_v24 }
  0x8e   : > { %1276 = vmatprep.mubr.bf16.mxu1 %v1404_v25 }
  0x94   : > { %1229 = vmatmul.mubr.bf16.gmra.mxu0 %v1401_v26 }
  0x95   : > { %1232 = vmatprep.mubr.bf16.mxu0 %v1402_v27  ;;  %1277 = vmatmul.mubr.bf16.gmra.mxu1 %v1405_v28 }
  0x96   : > { %1280 = vmatprep.mubr.bf16.mxu1 %v1410_v29 }
  0x9c   : > { %1233 = vmatmul.mubr.bf16.gmra.mxu0 %v1403_v30 }
  0x9d   : > { %1236 = vmatprep.mubr.bf16.mxu0 %v1406_v31  ;;  %1281 = vmatmul.mubr.bf16.gmra.mxu1 %v1411_v32 }
  0xa4   : > { %1237 = vmatmul.mubr.bf16.gmra.mxu0 %v1407_v33 }
  0xa5   : > { %1240 = vmatprep.mubr.bf16.mxu0 %v1408_v34 }
  0xac   : > { %1241 = vmatmul.mubr.bf16.gmra.mxu0 %v1409_v35 }
  0xad   : > { %1244 = vmatprep.mubr.bf16.mxu0 %v1412_v36 }
  0xb4   : > { %1245 = vmatmul.mubr.bf16.gmra.mxu0 %v1413_v37 }
  0xb5   : > { %1248 = vmatprep.mubr.bf16.mxu0 %v1414_v38 }
  0xbc   : > { %1249 = vmatmul.mubr.bf16.gmra.mxu0 %v1415_v39 }
 0x144   : > { %v1222_v40 = vpop.f32.mrf.mxu0 }
 0x145   : > { %v1270_v41 = vpop.f32.mrf.mxu1 }
 0x146   : > { %v536_v42 = vpop.f32.mrf.mxu0 }
 0x147   : > { %v825_v43 = vpop.f32.mrf.mxu1 }
 0x148   : > { %v888_v44 = vadd.f32 %v825_v43, %v536_v42  ;;  %v890_v45 = vadd.f32 %v1222_v40, %v825_v43  ;;  %v1223_v46 = vpop.f32.mrf.mxu0 }
 0x149   : > { %v1271_v47 = vpop.f32.mrf.mxu1 }
 0x14a   : > { %920 = vst [vmem:[%s1856_s23] sm:$0xff] %v888_v44  ;;  %922 = vst [vmem:[%s1856_s23 + $0x10] sm:$0xff] %v890_v45  ;;  %v539_v48 = vpop.f32.mrf.mxu0 }
 0x14b   : > { %v828_v49 = vpop.f32.mrf.mxu1 }
 0x14c   : > { %v889_v50 = vadd.f32 %v828_v49, %v539_v48  ;;  %v891_v51 = vadd.f32 %v1223_v46, %v828_v49  ;;  %v1226_v52 = vpop.f32.mrf.mxu0 }
 0x14d   : > { %v894_v53 = vadd.f32 %v1270_v41, %v1226_v52  ;;  %v1274_v54 = vpop.f32.mrf.mxu1 }
 0x14e   : > { %921 = vst [vmem:[%s1856_s23 + $0x8] sm:$0xff] %v889_v50  ;;  %923 = vst [vmem:[%s1856_s23 + $0x18] sm:$0xff] %v891_v51  ;;  %v552_v55 = vpop.f32.mrf.mxu0 }
 0x14f   : > { %926 = vst [vmem:[%s1856_s23 + $0x30] sm:$0xff] %v894_v53  ;;  %v892_v56 = vadd.f32 %v1270_v41, %v552_v55  ;;  %v841_v57 = vpop.f32.mrf.mxu1 }
 0x150   : > { %v1227_v58 = vpop.f32.mrf.mxu0 }
 0x151   : > { %924 = vst [vmem:[%s1856_s23 + $0x20] sm:$0xff] %v892_v56  ;;  %v895_v59 = vadd.f32 %v1271_v47, %v1227_v58  ;;  %v1275_v61 = vpop.f32.mrf.mxu1 }
 0x152   : > { %v555_v60 = vpop.f32.mrf.mxu0 }
 0x153   : > { %927 = vst [vmem:[%s1856_s23 + $0x38] sm:$0xff] %v895_v59  ;;  %v893_v62 = vadd.f32 %v1271_v47, %v555_v60  ;;  %v844_v2 = vpop.f32.mrf.mxu1 }
 0x154   : > { %v1230_v63 = vpop.f32.mrf.mxu0 }
 0x155   : > { %925 = vst [vmem:[%s1856_s23 + $0x28] sm:$0xff] %v893_v62  ;;  %v898_v0 = vadd.f32 %v1230_v63, %v841_v57  ;;  %v1278_v7 = vpop.f32.mrf.mxu1 }
 0x156   : > { %v568_v1 = vpop.f32.mrf.mxu0 }
 0x157   : > { %930 = vst [vmem:[%s1856_s23 + $0x50] sm:$0xff] %v898_v0  ;;  %v896_v3 = vadd.f32 %v841_v57, %v568_v1  ;;  %v857_v12 = vpop.f32.mrf.mxu1 }
 0x158   : > { %v1231_v4 = vpop.f32.mrf.mxu0 }
 0x159   : > { %928 = vst [vmem:[%s1856_s23 + $0x40] sm:$0xff] %v896_v3  ;;  %v899_v5 = vadd.f32 %v1231_v4, %v844_v2  ;;  %v1279_v17 = vpop.f32.mrf.mxu1 }
 0x15a   : > { %v571_v6 = vpop.f32.mrf.mxu0 }
 0x15b   : > { %931 = vst [vmem:[%s1856_s23 + $0x58] sm:$0xff] %v899_v5  ;;  %v897_v8 = vadd.f32 %v844_v2, %v571_v6  ;;  %v860_v22 = vpop.f32.mrf.mxu1 }
 0x15c   : > { %v1234_v9 = vpop.f32.mrf.mxu0 }
 0x15d   : > { %929 = vst [vmem:[%s1856_s23 + $0x48] sm:$0xff] %v897_v8  ;;  %v902_v10 = vadd.f32 %v1274_v54, %v1234_v9  ;;  %v1282_v27 = vpop.f32.mrf.mxu1 }
 0x15e   : > { %v584_v11 = vpop.f32.mrf.mxu0 }
 0x15f   : > { %934 = vst [vmem:[%s1856_s23 + $0x70] sm:$0xff] %v902_v10  ;;  %v900_v13 = vadd.f32 %v1274_v54, %v584_v11  ;;  %v873_v32 = vpop.f32.mrf.mxu1 }
 0x160   : > { %v1235_v14 = vpop.f32.mrf.mxu0 }
 0x161   : > { %932 = vst [vmem:[%s1856_s23 + $0x60] sm:$0xff] %v900_v13  ;;  %v903_v15 = vadd.f32 %v1275_v61, %v1235_v14  ;;  %v1283_v37 = vpop.f32.mrf.mxu1 }
 0x162   : > { %v587_v16 = vpop.f32.mrf.mxu0 }
 0x163   : > { %935 = vst [vmem:[%s1856_s23 + $0x78] sm:$0xff] %v903_v15  ;;  %v901_v18 = vadd.f32 %v1275_v61, %v587_v16  ;;  %v876_v42 = vpop.f32.mrf.mxu1 }
 0x164   : > { %v1238_v19 = vpop.f32.mrf.mxu0 }
 0x165   : > { %933 = vst [vmem:[%s1856_s23 + $0x68] sm:$0xff] %v901_v18  ;;  %v906_v20 = vadd.f32 %v1238_v19, %v857_v12 }
 0x166   : > { %v600_v21 = vpop.f32.mrf.mxu0 }
 0x167   : > { %938 = vst [vmem:[%s1856_s23 + $0x90] sm:$0xff] %v906_v20  ;;  %v904_v23 = vadd.f32 %v857_v12, %v600_v21 }
 0x168   : > { %v1239_v24 = vpop.f32.mrf.mxu0 }
 0x169   : > { %936 = vst [vmem:[%s1856_s23 + $0x80] sm:$0xff] %v904_v23  ;;  %v907_v25 = vadd.f32 %v1239_v24, %v860_v22 }
 0x16a   : > { %v603_v26 = vpop.f32.mrf.mxu0 }
 0x16b   : > { %939 = vst [vmem:[%s1856_s23 + $0x98] sm:$0xff] %v907_v25  ;;  %v905_v28 = vadd.f32 %v860_v22, %v603_v26 }
 0x16c   : > { %v1242_v29 = vpop.f32.mrf.mxu0 }
 0x16d   : > { %937 = vst [vmem:[%s1856_s23 + $0x88] sm:$0xff] %v905_v28  ;;  %v910_v30 = vadd.f32 %v1278_v7, %v1242_v29 }
 0x16e   : > { %v616_v31 = vpop.f32.mrf.mxu0 }
 0x16f   : > { %942 = vst [vmem:[%s1856_s23 + $0xb0] sm:$0xff] %v910_v30  ;;  %v908_v33 = vadd.f32 %v1278_v7, %v616_v31 }
 0x170   : > { %v1243_v34 = vpop.f32.mrf.mxu0 }
 0x171   : > { %940 = vst [vmem:[%s1856_s23 + $0xa0] sm:$0xff] %v908_v33  ;;  %v911_v35 = vadd.f32 %v1279_v17, %v1243_v34 }
 0x172   : > { %v619_v36 = vpop.f32.mrf.mxu0 }
 0x173   : > { %943 = vst [vmem:[%s1856_s23 + $0xb8] sm:$0xff] %v911_v35  ;;  %v909_v38 = vadd.f32 %v1279_v17, %v619_v36 }
 0x174   : > { %v1246_v39 = vpop.f32.mrf.mxu0 }
 0x175   : > { %941 = vst [vmem:[%s1856_s23 + $0xa8] sm:$0xff] %v909_v38  ;;  %v914_v40 = vadd.f32 %v1246_v39, %v873_v32 }
 0x176   : > { %v632_v41 = vpop.f32.mrf.mxu0 }
 0x177   : > { %946 = vst [vmem:[%s1856_s23 + $0xd0] sm:$0xff] %v914_v40  ;;  %v912_v43 = vadd.f32 %v873_v32, %v632_v41 }
 0x178   : > { %v1247_v44 = vpop.f32.mrf.mxu0 }
 0x179   : > { %944 = vst [vmem:[%s1856_s23 + $0xc0] sm:$0xff] %v912_v43  ;;  %v915_v45 = vadd.f32 %v1247_v44, %v876_v42 }
 0x17a   : > { %v635_v46 = vpop.f32.mrf.mxu0 }
 0x17b   : > { %947 = vst [vmem:[%s1856_s23 + $0xd8] sm:$0xff] %v915_v45  ;;  %v913_v47 = vadd.f32 %v876_v42, %v635_v46 }
 0x17c   : > { %v1250_v48 = vpop.f32.mrf.mxu0 }
 0x17d   : > { %945 = vst [vmem:[%s1856_s23 + $0xc8] sm:$0xff] %v913_v47  ;;  %v918_v49 = vadd.f32 %v1282_v27, %v1250_v48 }
 0x17e   : > { %v648_v50 = vpop.f32.mrf.mxu0 }
 0x17f   : > { %950 = vst [vmem:[%s1856_s23 + $0xf0] sm:$0xff] %v918_v49  ;;  %v916_v51 = vadd.f32 %v1282_v27, %v648_v50 }
 0x180   : > { %v1251_v52 = vpop.f32.mrf.mxu0 }
 0x181   : > { %948 = vst [vmem:[%s1856_s23 + $0xe0] sm:$0xff] %v916_v51  ;;  %v919_v53 = vadd.f32 %v1283_v37, %v1251_v52 }
 0x182   : > { %v651_v54 = vpop.f32.mrf.mxu0 }
 0x183   : > { %951 = vst [vmem:[%s1856_s23 + $0xf8] sm:$0xff] %v919_v53  ;;  %v917_v55 = vadd.f32 %v1283_v37, %v651_v54 }
 0x185   : > { %949 = vst [vmem:[%s1856_s23 + $0xe8] sm:$0xff] %v917_v55 }
 0x186   : > { %1537 = shalt.err (!%p1534_p0)
}
 0x187   : > { %s1538_s12 = scalar_lea.hbm %s1893_s26, 4096  ;;  %s1542_s5 = scalar_lea.hbm %s1949_s4, 8192 }
 0x188   : > { %p1539_p7 = scmp.ne.s32.totalorder %s1893_s26, %s1538_s12  ;;  %p1543_p8 = scmp.lt.s32.totalorder %s1893_s26, %s1949_s4 }
 0x189   : > { %p1544_p11 = scmp.lt.s32.totalorder %s1542_s5, %s1538_s12 }
 0x18a   : > { %p1540_p13 = pnand %p1539_p7, %p1741_p3 }
 0x18b   : > { %p1545_p2 = por %p1544_p11, %p1543_p8 }
 0x18c   : > { %p1541_p6 = pneg %p1540_p13 }
 0x18e   : > { %p1546_p4 = pnand %p1545_p2, %p1541_p6 }
 0x190   : > { %1549 = shalt.err (!%p1546_p4)
}
 0x191   : > { %s1625_s1 = smov 128   ;;  %s1626_s25 = smov 8  }
 0x192   : > { %1296 = dma.vmem_to_hbm [thread:$0]  (%p1741_p3), %s1895_s13, 4096, %s1893_s26, %s953_s6, %s1625_s1, %s1625_s1, %s1626_s25  }
 0x193 PF: > { %s984_s21 = sand.u32 1, %s1596_s15   ;;  %p1980_p5 = scmp.ne.s32.totalorder %s1961_s24, 0 }
 0x194   : > { %p1981_p1 = scmp.ge.s32.totalorder %s1616_s20, 2  ;;  %s985_s23 = scalar_lea.sflag [#allocation4], %s984_s21 }
 0x196   : > { %p1313_p12 = pnand %p1981_p1, %p1980_p5 }
 0x198   : > { %p1314_p10 = pneg %p1313_p12 }
 0x19a   : > { %1591 = dma.done.wait (%p1314_p10), %s985_s23, 4096  }
 0x19b   : > { %1593 = vsyncadd (%p1314_p10), %s985_s23, 4294963200  ;;  %s21_s20 = sadd.s32 1, %s1616_s20   ;;  %s1982_s11 = sld [smem:[#allocation16_spill]] }
 0x19c   : > { %p18_p9 = scmp.ge.s32.totalorder %s21_s20, 4   ;;  %s1983_s7 = sld [smem:[#allocation15_spill]] }
 0x19d   : > { %s1984_s15 = smov %s1600_s16  ;;  %s1985_s16 = smov %s1604_s17 }
 0x19e   : > { %s1987_s18 = smov %s1612_s19  ;;  %20 = sbr.rel (!%p18_p9) target bundleno = 10 (0xa), region = 100 }
 0x1a1   : > { %s1986_s17 = smov %s1982_s11 }
 0x1a2   : > { %s1988_s19 = smov %s1983_s7 }
 0x1a3   :  { %990 = vsyncpa [#allocation3], 1 }
 0x1a4   :  { %992 = vsyncpa [#allocation3 + $0x1], 1 }
 0x1a5   :  { %993 = vsyncpa [#allocation6], 1 }
 0x1a6   :  { %994 = vsyncpa [#allocation4], 1 }
 0x1a7   :  { %996 = vsyncpa [#allocation4 + $0x1], 1 }

</bundles_post_ra>
